<compile_context>
chip_gen: v5e
topology: v5e:2x2
jax: 0.10.0
libtpu: 0.0.40
codegen_flags: <defaults>
</compile_context>

<pallas_src>
import functools

import numpy as np
import jax
import jax.numpy as jnp
from jax import lax
from jax.experimental import pallas as pl
from jax.experimental.pallas import tpu as pltpu

NEG_SLOPE = 0.01                 # nn.LeakyReLU default
MXU_DTYPE = jnp.bfloat16         # MXU operand dtype; accumulation is always f32.


# -----------------------------------------------------------------------------
# Padded flat activation layout helpers (XLA-side, outside kernels).
# -----------------------------------------------------------------------------
def _round_up(v, m):
    return -(-v // m) * m


def _layout(h, w):
    """Lane layout for an HxW image: (Hp, Wp, P, P128, GUARD, L)."""
    hp, wp = h + 2, w + 2
    p = hp * wp
    p128 = _round_up(p, 128)
    guard = _round_up(wp + 1, 128)       # >= max |tap shift|, 128-aligned interior
    return hp, wp, p, p128, guard, guard + p128 + guard


def _interior_mask(h, w):
    """(1, P128) f32 mask: 1.0 on the HxW real pixels of the padded grid, else 0."""
    hp, wp, p, p128, _, _ = _layout(h, w)
    idx = np.arange(p128)
    row, col = idx // wp, idx % wp
    m = (idx < p) & (row >= 1) & (row <= hp - 2) & (col >= 1) & (col <= wp - 2)
    return jnp.asarray(m.astype(np.float32)[None, :])


def to_padded(x):
    """(N,C,H,W) -> (N,C,L) padded flat layout (zero ring / guards / tail)."""
    n, c, h, w = x.shape
    _, _, p, _, guard, L = _layout(h, w)
    xp = jnp.pad(x, ((0, 0), (0, 0), (1, 1), (1, 1))).reshape(n, c, p)
    return jnp.pad(xp, ((0, 0), (0, 0), (guard, L - guard - p)))


def from_padded(xp, h, w):
    """(N,C,L) padded flat layout -> (N,C,H,W)."""
    n, c, _ = xp.shape
    hp, wp, p, _, guard, _ = _layout(h, w)
    y = xp[:, :, guard:guard + p].reshape(n, c, hp, wp)
    return y[:, :, 1:hp - 1, 1:wp - 1]


def pixel_shuffle(x, r):
    n, c, h, w = x.shape
    co = c // (r * r)
    x = x.reshape(n, co, r, r, h, w)
    x = jnp.transpose(x, (0, 1, 4, 2, 5, 3))
    return x.reshape(n, co, h * r, w * r)


# -----------------------------------------------------------------------------
# Pallas kernels.
# -----------------------------------------------------------------------------
def _tap_shifts(wp):
    return [(kh - 1) * wp + (kw - 1) for kh in range(3) for kw in range(3)]


def _conv_on_slab(slab, w_flat, b_col, mask, *, wp, p128, guard, act):
    """One 3x3 conv on a padded-flat slab.

    slab:   (Cin, L)      f32 activation, padded layout
    w_flat: (Cout, 9*Cin) MXU operand dtype, tap-major im2col weights
    b_col:  (Cout, 1)     f32
    mask:   (1, P128)     bool, True on the real HxW pixels
    returns (Cout, P128)  f32, zero outside the real pixels
    """
    xb = slab.astype(w_flat.dtype)                       # bf16 MXU operands
    cols = jnp.concatenate(
        [xb[:, guard + s:guard + s + p128] for s in _tap_shifts(wp)], axis=0)
    acc = jnp.dot(w_flat, cols, preferred_element_type=jnp.float32) + b_col
    if act == "leaky_relu":
        acc = jnp.where(acc >= 0.0, acc, NEG_SLOPE * acc)
    elif act == "relu":
        acc = jnp.maximum(acc, 0.0)
    elif act == "sigmoid":
        acc = 1.0 / (1.0 + jnp.exp(-acc))
    # jnp.where (not multiply) so stray non-finite guard values can never leak
    # into the zero ring the next layer treats as conv padding.
    return jnp.where(mask, acc, 0.0)


def _single_conv_kernel(x_ref, w_ref, b_ref, m_ref, o_ref, *, wp, p128, guard, act):
    """Conv2d(k=3, s=1, p=1) + bias + activation; padded layout in / out."""
    mask = m_ref[...] > 0.5
    y = _conv_on_slab(x_ref[0], w_ref[...], b_ref[...], mask,
                      wp=wp, p128=p128, guard=guard, act=act)
    cout = o_ref.shape[1]
    zeros_g = jnp.zeros((cout, guard), dtype=o_ref.dtype)
    o_ref[0, :, 0:guard] = zeros_g                                    # left guard
    o_ref[0, :, guard + p128:guard + p128 + guard] = zeros_g          # right guard
    o_ref[0, :, guard:guard + p128] = y.astype(o_ref.dtype)           # aligned, lane-dense


def _res_chain_kernel(x_ref, w_ref, b_ref, m_ref, o_ref, *, wp, p128, guard, n_blocks):
    """n_blocks x ResidualBlock (conv+LReLU+conv+LReLU+skip), fused in one call.

    The running activation lives in the output VMEM block (o_ref) between the
    2*n_blocks fused convs; nothing touches HBM until the grid step ends.
    """
    mask = m_ref[...] > 0.5
    o_ref[0] = x_ref[0]
    for r in range(n_blocks):
        res = o_ref[0, :, guard:guard + p128]            # residual (interior)
        for s in range(2):
            y = _conv_on_slab(o_ref[0], w_ref[2 * r + s], b_ref[2 * r + s], mask,
                              wp=wp, p128=p128, guard=guard, act="leaky_relu")
            if s == 1:
                y = y + res
            o_ref[0, :, guard:guard + p128] = y.astype(o_ref.dtype)


# -----------------------------------------------------------------------------
# pallas_call wrappers.
# -----------------------------------------------------------------------------
def _conv_call(xp, prep, h, w, act):
    n, cin, L = xp.shape
    _, wp, _, p128, guard, _ = _layout(h, w)
    cout = prep["w"].shape[0]
    kern = functools.partial(_single_conv_kernel, wp=wp, p128=p128, guard=guard, act=act)
    return pl.pallas_call(
        kern,
        out_shape=jax.ShapeDtypeStruct((n, cout, L), jnp.float32),
        grid_spec=pltpu.PrefetchScalarGridSpec(
            num_scalar_prefetch=0,
            grid=(n,),
            in_specs=[
                pl.BlockSpec((1, cin, L), lambda i: (i, 0, 0)),
                pl.BlockSpec(prep["w"].shape, lambda i: (0, 0)),
                pl.BlockSpec(prep["b"].shape, lambda i: (0, 0)),
                pl.BlockSpec((1, p128), lambda i: (0, 0)),
            ],
            out_specs=pl.BlockSpec((1, cout, L), lambda i: (i, 0, 0)),
        ),
        compiler_params=pltpu.CompilerParams(dimension_semantics=("parallel",)),
    )(xp, prep["w"], prep["b"], _interior_mask(h, w))


def _chain_call(xp, prep, h, w):
    n, c, L = xp.shape
    _, wp, _, p128, guard, _ = _layout(h, w)
    n_blocks = prep["w"].shape[0] // 2
    kern = functools.partial(_res_chain_kernel, wp=wp, p128=p128, guard=guard,
                             n_blocks=n_blocks)
    return pl.pallas_call(
        kern,
        out_shape=jax.ShapeDtypeStruct((n, c, L), jnp.float32),
        grid_spec=pltpu.PrefetchScalarGridSpec(
            num_scalar_prefetch=0,
            grid=(n,),
            in_specs=[
                pl.BlockSpec((1, c, L), lambda i: (i, 0, 0)),
                pl.BlockSpec(prep["w"].shape, lambda i: (0, 0, 0)),
                pl.BlockSpec(prep["b"].shape, lambda i: (0, 0, 0)),
                pl.BlockSpec((1, p128), lambda i: (0, 0)),
            ],
            out_specs=pl.BlockSpec((1, c, L), lambda i: (i, 0, 0)),
        ),
        compiler_params=pltpu.CompilerParams(dimension_semantics=("parallel",)),
    )(xp, prep["w"], prep["b"], _interior_mask(h, w))


# -----------------------------------------------------------------------------
# Parameter init / one-time layout prep (outside the hot path).
# -----------------------------------------------------------------------------
def _conv_init(key, cin, cout, scale=1.0):
    kw_, kb_ = jax.random.split(key)
    std = scale * (1.0 / (cin * 9)) ** 0.5
    return {"w": std * jax.random.normal(kw_, (cout, cin, 3, 3), jnp.float32),
            "b": 0.01 * jax.random.normal(kb_, (cout,), jnp.float32)}


def init_params(key, in_channels=3, width=32):
    keys = iter(jax.random.split(key, 64))
    conv = lambda cin, cout, scale=1.0: _conv_init(next(keys), cin, cout, scale)
    resblock = lambda c: {"conv1": conv(c, c, 0.5), "conv2": conv(c, c, 0.5)}

    def decoder(out_ch):
        return {"d2": conv(width * 4, width * 8),
                "d1_res": [resblock(width * 2) for _ in range(2)],
                "d1_up": conv(width * 2, width * 4),
                "d1_post": resblock(width),
                "d0_res": [resblock(width) for _ in range(2)],
                "d0_out": conv(width, out_ch)}

    return {"intro": conv(in_channels, width),
            "encoder1": [resblock(width) for _ in range(3)],
            "encoder2_down": conv(width, width * 2),
            "encoder2": [resblock(width * 2) for _ in range(3)],
            "encoder3": conv(width * 2, width * 4),
            "a_dec": decoder(3),
            "t_dec": decoder(1)}


def _flatten_w(w):
    cout, cin = w.shape[0], w.shape[1]
    # OIHW -> (Cout, 9*Cin), tap-major (kh, kw) then cin -- matches the im2col order.
    return jnp.transpose(w, (0, 2, 3, 1)).reshape(cout, 9 * cin)


def _prep_conv(c, dtype):
    w = c["w"]
    cin = w.shape[1]
    cin_p = _round_up(cin, 16)           # keep im2col sublane chunks vreg-aligned (bf16)
    if cin_p != cin:
        w = jnp.pad(w, ((0, 0), (0, cin_p - cin), (0, 0), (0, 0)))
    return {"w": _flatten_w(w).astype(dtype),
            "b": c["b"].reshape(-1, 1).astype(jnp.float32)}


def _prep_chain(blocks, dtype):
    ws, bs = [], []
    for r in blocks:
        for k in ("conv1", "conv2"):
            ws.append(_flatten_w(r[k]["w"]))
            bs.append(r[k]["b"].reshape(-1, 1))
    return {"w": jnp.stack(ws).astype(dtype),
            "b": jnp.stack(bs).astype(jnp.float32)}


def prepare_params(p, dtype=MXU_DTYPE):
    dec = lambda d: {"d2": _prep_conv(d["d2"], dtype),
                     "d1_res": _prep_chain(d["d1_res"], dtype),
                     "d1_up": _prep_conv(d["d1_up"], dtype),
                     "d1_post": _prep_chain([d["d1_post"]], dtype),
                     "d0_res": _prep_chain(d["d0_res"], dtype),
                     "d0_out": _prep_conv(d["d0_out"], dtype)}
    return {"intro": _prep_conv(p["intro"], dtype),
            "encoder1": _prep_chain(p["encoder1"], dtype),
            "encoder2_down": _prep_conv(p["encoder2_down"], dtype),
            "encoder2": _prep_chain(p["encoder2"], dtype),
            "encoder3": _prep_conv(p["encoder3"], dtype),
            "a_dec": dec(p["a_dec"]),
            "t_dec": dec(p["t_dec"])}


# -----------------------------------------------------------------------------
# Pallas forward (padded-layout activations between kernels).
# -----------------------------------------------------------------------------
def pallas_forward(prep, x, depth):
    n, cin, h, w = x.shape
    h2, w2, h4, w4 = h // 2, w // 2, h // 4, w // 4

    cin_p = prep["intro"]["w"].shape[1] // 9
    x = jnp.pad(x, ((0, 0), (0, cin_p - cin), (0, 0), (0, 0)))
    hcur = _conv_call(to_padded(x), prep["intro"], h, w, "none")

    enc1 = _chain_call(hcur, prep["encoder1"], h, w)

    # Conv2d(k=3, s=2, p=1) == stride-1 conv + subsample; subsample is folded
    # into the next layer's half-resolution padded-layout prep (one XLA copy).
    down = _conv_call(enc1, prep["encoder2_down"], h, w, "none")
    down = to_padded(from_padded(down, h, w)[:, :, ::2, ::2])
    enc2 = _chain_call(down, prep["encoder2"], h2, w2)

    e3 = _conv_call(enc2, prep["encoder3"], h2, w2, "none")
    enc3 = to_padded(from_padded(e3, h2, w2)[:, :, ::2, ::2])

    def decode(dp, out_act):
        d2 = _conv_call(enc3, dp["d2"], h4, w4, "none")
        d2 = to_padded(pixel_shuffle(from_padded(d2, h4, w4), 2)) + enc2
        d1 = _chain_call(d2, dp["d1_res"], h2, w2)
        d1 = _conv_call(d1, dp["d1_up"], h2, w2, "none")
        d1 = to_padded(pixel_shuffle(from_padded(d1, h2, w2), 2))
        d1 = _chain_call(d1, dp["d1_post"], h, w) + enc1
        d0 = _chain_call(d1, dp["d0_res"], h, w)
        return _conv_call(d0, dp["d0_out"], h, w, out_act)   # padded (N, Cout, L)

    # a-branch: padded output has zeros everywhere outside the HxW real pixels,
    # so the global average pool is a plain lane sum / (H*W).
    a0 = decode(prep["a_dec"], "sigmoid")
    a = 1.0 / (1.0 + jnp.exp(-(jnp.sum(a0, axis=2) / (h * w))))
    b = from_padded(decode(prep["t_dec"], "relu"), h, w)
    t = jnp.exp(-b * depth)
    # TODO(synk): ParameterEstimator.forward also returns self.refine(t), but
    # `refine` is never defined in the reference module, so refine_t cannot be
    # implemented.
    return a, t


# -----------------------------------------------------------------------------
# Pure-XLA reference (spec), with optional bf16 operand matching.
# -----------------------------------------------------------------------------
def ref_conv(x, c, act="none", stride=1, *, precision=lax.Precision.HIGHEST,
             operand_dtype=None):
    w, xin = c["w"], x
    if operand_dtype is not None:
        w, xin = w.astype(operand_dtype), x.astype(operand_dtype)
    y = lax.conv_general_dilated(
        xin, w, (stride, stride), ((1, 1), (1, 1)),
        dimension_numbers=("NCHW", "OIHW", "NCHW"),
        precision=precision, preferred_element_type=jnp.float32)
    y = y + c["b"].reshape(1, -1, 1, 1)
    if act == "leaky_relu":
        y = jnp.where(y >= 0.0, y, NEG_SLOPE * y)
    elif act == "relu":
        y = jnp.maximum(y, 0.0)
    elif act == "sigmoid":
        y = 1.0 / (1.0 + jnp.exp(-y))
    return y


def reference_forward(params, x, depth, *, operand_dtype=None):
    conv = functools.partial(ref_conv, operand_dtype=operand_dtype)

    def resblock(h_, r):
        y = conv(h_, r["conv1"], act="leaky_relu")
        y = conv(y, r["conv2"], act="leaky_relu")
        return y + h_

    h_ = conv(x, params["intro"])
    enc1 = h_
    for r in params["encoder1"]:
        enc1 = resblock(enc1, r)
    h_ = conv(enc1, params["encoder2_down"], stride=2)
    for r in params["encoder2"]:
        h_ = resblock(h_, r)
    enc2 = h_
    enc3 = conv(enc2, params["encoder3"], stride=2)

    def decode(dp, out_act):
        d2 = pixel_shuffle(conv(enc3, dp["d2"]), 2) + enc2
        d1 = d2
        for r in dp["d1_res"]:
            d1 = resblock(d1, r)
        d1 = pixel_shuffle(conv(d1, dp["d1_up"]), 2)
        d1 = resblock(d1, dp["d1_post"]) + enc1
        d0 = d1
        for r in dp["d0_res"]:
            d0 = resblock(d0, r)
        return conv(d0, dp["d0_out"], act=out_act)

    a0 = decode(params["a_dec"], "sigmoid")
    a = 1.0 / (1.0 + jnp.exp(-jnp.mean(a0, axis=(2, 3))))
    b = decode(params["t_dec"], "relu")
    t = jnp.exp(-b * depth)
    return a, t


@jax.jit
def parameter_estimator_pallas(prepared, x, depth):
    return pallas_forward(prepared, x, depth)


@functools.partial(jax.jit, static_argnames=("operand_dtype",))
def parameter_estimator_reference(params, x, depth, operand_dtype=None):
    return reference_forward(params, x, depth, operand_dtype=operand_dtype)


# -----------------------------------------------------------------------------
if __name__ == "__main__":
    key = jax.random.PRNGKey(0)
    kp, kx, kd = jax.random.split(key, 3)

    N, C, H, W = 2, 3, 16, 16
    WIDTH = 32
    params = init_params(kp, in_channels=C, width=WIDTH)
    prepared = prepare_params(params, dtype=MXU_DTYPE)

    x = jax.random.normal(kx, (N, C, H, W), dtype=jnp.float32)
    depth = jax.random.uniform(kd, (N, 1, H, W), dtype=jnp.float32)

    cin_p = prepared["intro"]["w"].shape[1] // 9
    x_pad = jnp.pad(x, ((0, 0), (0, cin_p - C), (0, 0), (0, 0)))

    # Unit 1: fused single-conv kernel vs operand-precision-matched lax.conv.
    y_pal = jax.block_until_ready(jax.jit(lambda xx: from_padded(
        _conv_call(to_padded(xx), prepared["intro"], H, W, "leaky_relu"), H, W))(x_pad))
    y_ref = ref_conv(x, params["intro"], act="leaky_relu", operand_dtype=jnp.bfloat16)
    assert y_pal.shape == (N, WIDTH, H, W)
    assert jnp.allclose(y_pal, y_ref, atol=1e-3, rtol=1e-3), "single-conv kernel mismatch"

    # Unit 2: fused residual-block-chain kernel (3 blocks) vs matched reference.
    z_in = y_ref
    z_pal = jax.block_until_ready(jax.jit(lambda xx: from_padded(
        _chain_call(to_padded(xx), prepared["encoder1"], H, W), H, W))(z_in))
    z_ref = z_in
    for r in params["encoder1"]:
        z_ref = ref_conv(ref_conv(z_ref, r["conv1"], act="leaky_relu",
                                  operand_dtype=jnp.bfloat16),
                         r["conv2"], act="leaky_relu",
                         operand_dtype=jnp.bfloat16) + z_ref
    assert jnp.allclose(z_pal, z_ref, atol=2e-3, rtol=2e-3), "residual-chain kernel mismatch"

    # Full ParameterEstimator forward (bf16 MXU operands, f32 accumulation).
    a, t = jax.block_until_ready(parameter_estimator_pallas(prepared, x, depth))
    # Reference with the SAME operand precision (bf16 conv inputs, f32 accumulate):
    # the only remaining differences are f32 summation order -> tight tolerance.
    a_m, t_m = jax.block_until_ready(
        parameter_estimator_reference(params, x, depth, operand_dtype=jnp.bfloat16))
    # Full-f32 (HIGHEST) reference: `a` is globally pooled so the bf16-operand
    # drift is tiny there; checked at 1e-2.
    a_f, _ = jax.block_until_ready(
        parameter_estimator_reference(params, x, depth, operand_dtype=None))

    assert a.shape == (N, 3) and t.shape == (N, 1, H, W)
    assert bool(jnp.all(jnp.isfinite(t))) and bool(jnp.all(jnp.isfinite(a)))
    assert jnp.allclose(a, a_m, atol=5e-3, rtol=5e-3), "`a` mismatch vs matched reference"
    assert jnp.allclose(t, t_m, atol=5e-3, rtol=5e-3), "`t` mismatch vs matched reference"
    assert jnp.allclose(a, a_f, atol=1e-2, rtol=1e-2), "`a` mismatch vs f32 reference"

    print("KERNEL_OK")
</pallas_src>

<mosaic_0001>
module attributes {stable_mosaic.version = 11 : i64} {
  func.func @_single_conv_kernel(%arg0: i32, %arg1: memref<1x16x640xf32, #tpu.memory_space<vmem>>, %arg2: memref<32x144xbf16, #tpu.memory_space<vmem>>, %arg3: memref<32x1xf32, #tpu.memory_space<vmem>>, %arg4: memref<1x384xf32, #tpu.memory_space<vmem>>, %arg5: memref<1x32x640xf32, #tpu.memory_space<vmem>>) attributes {dimension_semantics = [#tpu.dimension_semantics<parallel>], iteration_bounds = array<i64: 2>, scalar_prefetch = 0 : i64, scratch_operands = 0 : i64, tpu.core_type = #tpu.core_type<tc>, window_params = [{transform_indices = @transform_0, window_bounds = array<i64: 1, 16, 640>}, {pipeline_mode = #tpu.pipeline_mode<synchronous>, transform_indices = @transform_1, window_bounds = array<i64: 32, 144>}, {pipeline_mode = #tpu.pipeline_mode<synchronous>, transform_indices = @transform_2, window_bounds = array<i64: 32, 1>}, {pipeline_mode = #tpu.pipeline_mode<synchronous>, transform_indices = @transform_3, window_bounds = array<i64: 1, 384>}, {transform_indices = @transform_4, window_bounds = array<i64: 1, 32, 640>}]} {
    %c0 = arith.constant 0 : index
    %c0_0 = arith.constant 0 : index
    %0 = vector.load %arg4[%c0, %c0_0] : memref<1x384xf32, #tpu.memory_space<vmem>>, vector<1x384xf32>
    %cst = arith.constant 5.000000e-01 : f32
    %1 = vector.broadcast %cst : f32 to vector<1x384xf32>
    %2 = arith.cmpf ogt, %0, %1 : vector<1x384xf32>
    %c0_1 = arith.constant 0 : index
    %c0_2 = arith.constant 0 : index
    %c0_3 = arith.constant 0 : index
    %3 = vector.load %arg1[%c0_1, %c0_2, %c0_3] : memref<1x16x640xf32, #tpu.memory_space<vmem>>, vector<1x16x640xf32>
    %4 = vector.shape_cast %3 : vector<1x16x640xf32> to vector<16x640xf32>
    %c0_4 = arith.constant 0 : index
    %c0_5 = arith.constant 0 : index
    %5 = vector.load %arg2[%c0_4, %c0_5] : memref<32x144xbf16, #tpu.memory_space<vmem>>, vector<32x144xbf16>
    %c0_6 = arith.constant 0 : index
    %c0_7 = arith.constant 0 : index
    %6 = vector.load %arg3[%c0_6, %c0_7] : memref<32x1xf32, #tpu.memory_space<vmem>>, vector<32x1xf32>
    %7 = arith.truncf %4 : vector<16x640xf32> to vector<16x640xbf16>
    %8 = vector.extract_strided_slice %7 {offsets = [0, 109], sizes = [16, 384], strides = [1, 1]} : vector<16x640xbf16> to vector<16x384xbf16>
    %9 = vector.extract_strided_slice %7 {offsets = [0, 110], sizes = [16, 384], strides = [1, 1]} : vector<16x640xbf16> to vector<16x384xbf16>
    %10 = vector.extract_strided_slice %7 {offsets = [0, 111], sizes = [16, 384], strides = [1, 1]} : vector<16x640xbf16> to vector<16x384xbf16>
    %11 = vector.extract_strided_slice %7 {offsets = [0, 127], sizes = [16, 384], strides = [1, 1]} : vector<16x640xbf16> to vector<16x384xbf16>
    %12 = vector.extract_strided_slice %7 {offsets = [0, 128], sizes = [16, 384], strides = [1, 1]} : vector<16x640xbf16> to vector<16x384xbf16>
    %13 = vector.extract_strided_slice %7 {offsets = [0, 129], sizes = [16, 384], strides = [1, 1]} : vector<16x640xbf16> to vector<16x384xbf16>
    %14 = vector.extract_strided_slice %7 {offsets = [0, 145], sizes = [16, 384], strides = [1, 1]} : vector<16x640xbf16> to vector<16x384xbf16>
    %15 = vector.extract_strided_slice %7 {offsets = [0, 146], sizes = [16, 384], strides = [1, 1]} : vector<16x640xbf16> to vector<16x384xbf16>
    %16 = vector.extract_strided_slice %7 {offsets = [0, 147], sizes = [16, 384], strides = [1, 1]} : vector<16x640xbf16> to vector<16x384xbf16>
    %17 = tpu.concatenate %8, %9, %10, %11, %12, %13, %14, %15, %16 in 0 : vector<16x384xbf16>, vector<16x384xbf16>, vector<16x384xbf16>, vector<16x384xbf16>, vector<16x384xbf16>, vector<16x384xbf16>, vector<16x384xbf16>, vector<16x384xbf16>, vector<16x384xbf16> -> vector<144x384xbf16>
    %cst_8 = arith.constant dense<0.000000e+00> : vector<32x384xf32>
    %18 = tpu.matmul %5, %17, %cst_8 {dimension_numbers = #tpu.dot_dimension_numbers<[1], [0], [0], [1], [0, 0, 1, 1], [], []>} : vector<32x144xbf16>, vector<144x384xbf16>, vector<32x384xf32> -> vector<32x384xf32>
    %19 = vector.broadcast %6 : vector<32x1xf32> to vector<32x384xf32>
    %20 = arith.addf %18, %19 : vector<32x384xf32>
    %cst_9 = arith.constant 0.000000e+00 : f32
    %21 = vector.broadcast %cst_9 : f32 to vector<32x384xf32>
    %22 = arith.cmpf oge, %20, %21 : vector<32x384xf32>
    %cst_10 = arith.constant 0.00999999977 : f32
    %23 = vector.broadcast %cst_10 : f32 to vector<32x384xf32>
    %24 = arith.mulf %23, %20 : vector<32x384xf32>
    %25 = arith.select %22, %20, %24 : vector<32x384xi1>, vector<32x384xf32>
    %cst_11 = arith.constant 0.000000e+00 : f32
    %26 = vector.shape_cast %2 : vector<1x384xi1> to vector<1x384xi1>
    %27 = vector.broadcast %26 : vector<1x384xi1> to vector<32x384xi1>
    %28 = vector.broadcast %cst_11 : f32 to vector<32x384xf32>
    %29 = arith.select %27, %25, %28 : vector<32x384xi1>, vector<32x384xf32>
    %cst_12 = arith.constant 0.000000e+00 : f32
    %30 = vector.broadcast %cst_12 : f32 to vector<32x128xf32>
    %c0_13 = arith.constant 0 : index
    %c0_14 = arith.constant 0 : index
    %c0_15 = arith.constant 0 : index
    %31 = vector.load %arg5[%c0_13, %c0_14, %c0_15] : memref<1x32x640xf32, #tpu.memory_space<vmem>>, vector<1x32x128xf32>
    %32 = vector.shape_cast %31 : vector<1x32x128xf32> to vector<32x128xf32>
    %33 = vector.shape_cast %30 : vector<32x128xf32> to vector<1x32x128xf32>
    tpu.vector_store %arg5[%c0_13, %c0_14, %c0_15], %33 {strides = array<i32>} : memref<1x32x640xf32, #tpu.memory_space<vmem>>, vector<1x32x128xf32>,
    %c0_16 = arith.constant 0 : index
    %c0_17 = arith.constant 0 : index
    %c512 = arith.constant 512 : index
    %34 = vector.load %arg5[%c0_16, %c0_17, %c512] : memref<1x32x640xf32, #tpu.memory_space<vmem>>, vector<1x32x128xf32>
    %35 = vector.shape_cast %34 : vector<1x32x128xf32> to vector<32x128xf32>
    %36 = vector.shape_cast %30 : vector<32x128xf32> to vector<1x32x128xf32>
    tpu.vector_store %arg5[%c0_16, %c0_17, %c512], %36 {strides = array<i32>} : memref<1x32x640xf32, #tpu.memory_space<vmem>>, vector<1x32x128xf32>,
    %c0_18 = arith.constant 0 : index
    %c0_19 = arith.constant 0 : index
    %c128 = arith.constant 128 : index
    %37 = vector.load %arg5[%c0_18, %c0_19, %c128] : memref<1x32x640xf32, #tpu.memory_space<vmem>>, vector<1x32x384xf32>
    %38 = vector.shape_cast %37 : vector<1x32x384xf32> to vector<32x384xf32>
    %39 = vector.shape_cast %29 : vector<32x384xf32> to vector<1x32x384xf32>
    tpu.vector_store %arg5[%c0_18, %c0_19, %c128], %39 {strides = array<i32>} : memref<1x32x640xf32, #tpu.memory_space<vmem>>, vector<1x32x384xf32>,
    return
  }
  func.func @transform_0(%arg0: i32) -> (i32, i32, i32) {
    %c0_i32 = arith.constant 0 : i32
    %c0_i32_0 = arith.constant 0 : i32
    %c0_i32_1 = arith.constant 0 : i32
    return %arg0, %c0_i32, %c0_i32_0 : i32, i32, i32
  }
  func.func @transform_1(%arg0: i32) -> (i32, i32) {
    %c0_i32 = arith.constant 0 : i32
    %c0_i32_0 = arith.constant 0 : i32
    %c0_i32_1 = arith.constant 0 : i32
    return %c0_i32, %c0_i32_0 : i32, i32
  }
  func.func @transform_2(%arg0: i32) -> (i32, i32) {
    %c0_i32 = arith.constant 0 : i32
    %c0_i32_0 = arith.constant 0 : i32
    %c0_i32_1 = arith.constant 0 : i32
    return %c0_i32, %c0_i32_0 : i32, i32
  }
  func.func @transform_3(%arg0: i32) -> (i32, i32) {
    %c0_i32 = arith.constant 0 : i32
    %c0_i32_0 = arith.constant 0 : i32
    %c0_i32_1 = arith.constant 0 : i32
    return %c0_i32, %c0_i32_0 : i32, i32
  }
  func.func @transform_4(%arg0: i32) -> (i32, i32, i32) {
    %c0_i32 = arith.constant 0 : i32
    %c0_i32_0 = arith.constant 0 : i32
    %c0_i32_1 = arith.constant 0 : i32
    return %arg0, %c0_i32, %c0_i32_0 : i32, i32, i32
  }
}

</mosaic_0001>

<bundles_post_ra>
// kernel: _lambda_.1
= control target key start
LH: loop header
LB: loop body
LE: loop exit
PB: predicated region body
PF: predicated region fallthrough
CT: control target
= control target key end

     0   :  { %s858_s15 = smov 0   ;;  %s1152_s0 = inlined_call_operand.vmem [shape: f32[2,16,640], index: 0, kind: input, shape index: {}]   ;;  %s1153_s1 = inlined_call_operand.vmem [shape: bf16[32,144], index: 1, kind: input, shape index: {}]   ;;  %s1154_s2 = inlined_call_operand.vmem [shape: f32[32,1], index: 2, kind: input, shape index: {}]   ;;  %s1155_s3 = inlined_call_operand.vmem [shape: f32[1,384], index: 3, kind: input, shape index: {}]   ;;  %s1156_s4 = inlined_call_operand.vmem [shape: f32[2,32,640], index: 4, kind: output, shape index: {}]  }
   0x1 LB: > { %s755_s16 = sadd.s32 4294967295, %s820_s15   ;;  %p759_p0 = scmp.ge.s32.totalorder %s820_s15, 1  ;;  %s820_s15 = sphi %s858_s15, %s14_s15  }
   0x2   : > { %p162_p1 = scmp.lt.s32.totalorder %s820_s15, 3 }
   0x4   : > { %p163_p2 = pnand %p759_p0, %p162_p1 }
   0x5   : > { %p188_p3 = scmp.lt.s32.totalorder (!%p163_p2), %s755_s16, 1  ;;  %s823_s25 = smov (!%p163_p2), 90  }
   0x6   : > { %166 = sbr.rel (%p163_p2) target bundleno = 532 (0x214), region = 36  ;;  %s824_s26 = smov (!%p163_p2), 91  }
   0x7   : > { %s825_s27 = smov (!%p163_p2), 92   ;;  %s826_s28 = smov (!%p163_p2), 108  }
   0x8   : > { %s827_s29 = smov (!%p163_p2), 109   ;;  %s828_s30 = smov (!%p163_p2), 110  }
   0x9   : > { %s829_s5 = smov (!%p163_p2), 126   ;;  %s830_s6 = smov (!%p163_p2), 127  }
   0xa   : > { %s831_s7 = smov (!%p163_p2), 19  }
   0xb   : > { %s1164_s16 = smov (!%p188_p3, %s755_s16), 1  ;;  %v822_v5 = vmov 0.0   ;;  %vm335_vm0 = vcmask 736256   ;;  %vm323_vm1 = vcmask 744448   ;;  %vm311_vm2 = vcmask 752640  }
   0xc   : > { %s790_s17 = smul.u32 80, %s1164_s16  ;;  %vm299_vm3 = vcmask 883712   ;;  %vm283_vm4 = vcmask 891904   ;;  %vm273_vm5 = vcmask 900096   ;;  %vm261_vm6 = vcmask 1031168  }
   0xd   : > { %s791_s18 = smul.u32 160, %s1164_s16  ;;  %vm249_vm7 = vcmask 1039360   ;;  %vm449_vm8 = vcmask 154624   ;;  %vm504_vm9 = vcmask 130048  }
   0xe   : > { %s869_s21 = scalar_lea.vmem %s1152_s0, %s790_s17 }
   0xf   : > { %s874_s24 = scalar_lea.vmem %s1156_s4, %s791_s18  ;;  %v203_v0 = vld [vmem:[%s869_s21 + $0x10] sm:$0xff]  ;;  %v204_v1 = vld [vmem:[%s869_s21 + $0x18] sm:$0xff]  ;;  %v209_v3 = vld [vmem:[%s869_s21 + $0x40] sm:$0xff] }
  0x10   : > { %v208_v2 = vld [vmem:[%s869_s21 + $0x38] sm:$0xff]  ;;  %v220_v4 = vpack.c.bf16 %v204_v1, %v203_v0  ;;  %680 = vst [vmem:[%s874_s24] sm:$0xff] %v822_v5  ;;  %v201_v6 = vld [vmem:[%s869_s21] sm:$0xff]  ;;  %v202_v7 = vld [vmem:[%s869_s21 + $0x8] sm:$0xff] }
  0x11   : > { %v223_v8 = vpack.c.bf16 %v209_v3, %v208_v2  ;;  %681 = vst [vmem:[%s874_s24 + $0x28] sm:$0xff] %v822_v5  ;;  %v206_v9 = vld [vmem:[%s869_s21 + $0x28] sm:$0xff]  ;;  %v207_v10 = vld [vmem:[%s869_s21 + $0x30] sm:$0xff]  ;;  %v219_v11 = vpack.c.bf16 %v202_v7, %v201_v6  ;;  %v205_v22 = vld [vmem:[%s869_s21 + $0x20] sm:$0xff] }
  0x12   : > { %v232_v12 = vunpack.c.h.b16 %v220_v4  ;;  %682 = vst [vmem:[%s874_s24 + $0x50] sm:$0xff] %v822_v5  ;;  %v222_v13 = vpack.c.bf16 %v207_v10, %v206_v9  ;;  %v231_v14 = vunpack.c.l.b16 %v220_v4  ;;  %v210_v23 = vld [vmem:[%s869_s21 + $0x48] sm:$0xff]  ;;  %v221_v24 = vpack.c.bf16 %v205_v22, %v205_v22 }
  0x13   : > { %v236_v15 = vunpack.c.h.b16 %v223_v8  ;;  %683 = vst [vmem:[%s874_s24 + $0x78] sm:$0xff] %v822_v5  ;;  %v230_v16 = vunpack.c.h.b16 %v219_v11  ;;  %v235_v17 = vunpack.c.l.b16 %v223_v8  ;;  %v224_v25 = vpack.c.bf16 %v210_v23, %v210_v23 }
  0x14   : > { %684 = vst [vmem:[%s874_s24 + $0x20] sm:$0xff] %v822_v5  ;;  %v234_v18 = vunpack.c.h.b16 %v222_v13  ;;  %v288_v26 = vunpack.c.l.b16 %v221_v24  ;;  %v229_v29 = vunpack.c.l.b16 %v219_v11  ;;  %v233_v30 = vunpack.c.l.b16 %v222_v13 }
  0x15   : > { %v889_v19 = vpack.c.b16 %v236_v15, %v232_v12  ;;  %685 = vst [vmem:[%s874_s24 + $0x48] sm:$0xff] %v822_v5  ;;  %v892_v20 = vpack.c.b16 %v235_v17, %v231_v14  ;;  %v289_v27 = vunpack.c.l.b16 %v224_v25 }
  0x16   : > { %686 = vst [vmem:[%s874_s24 + $0x70] sm:$0xff] %v822_v5  ;;  %v895_v21 = vpack.c.b16 %v234_v18, %v230_v16  ;;  %v914_v31 = vpack.c.b16 %v233_v30, %v229_v29 }
  0x17   : > { %687 = vst [vmem:[%s874_s24 + $0x98] sm:$0xff] %v822_v5  ;;  %331 = vrot.lane.b32.xlu1 %v889_v19, %s823_s25  ;;  %317 = vrot.lane.b32.xlu2 %v892_v20, %s824_s26  ;;  %v290_v28 = vpack.c.b16 %v289_v27, %v288_v26 }
  0x18   : > { %327 = vrot.lane.b32.xlu0 %v895_v21, %s823_s25 }
  0x1f   : > { %315 = vrot.lane.b32.xlu1 %v895_v21, %s824_s26  ;;  %319 = vrot.lane.b32.xlu2 %v889_v19, %s824_s26 }
  0x20   : > { %329 = vrot.lane.b32.xlu0 %v892_v20, %s823_s25 }
  0x27   : > { %305 = vrot.lane.b32.xlu1 %v892_v20, %s825_s27  ;;  %307 = vrot.lane.b32.xlu2 %v889_v19, %s825_s27 }
  0x28   : > { %303 = vrot.lane.b32.xlu0 %v895_v21, %s825_s27 }
  0x2f   : > { %291 = vrot.lane.b32.xlu1 %v895_v21, %s826_s28  ;;  %293 = vrot.lane.b32.xlu2 %v892_v20, %s826_s28 }
  0x30   : > { %321 = vrot.lane.b32.xlu0 %v290_v28, %s824_s26 }
  0x37   : > { %309 = vrot.lane.b32.xlu1 %v290_v28, %s825_s27  ;;  %277 = vrot.lane.b32.xlu2 %v895_v21, %s827_s29 }
  0x38   : > { %295 = vrot.lane.b32.xlu0 %v889_v19, %s826_s28 }
  0x3f   : > { %281 = vrot.lane.b32.xlu1 %v889_v19, %s827_s29  ;;  %297 = vrot.lane.b32.xlu2 %v290_v28, %s826_s28 }
  0x40   : > { %279 = vrot.lane.b32.xlu0 %v892_v20, %s827_s29 }
  0x47   : > { %269 = vrot.lane.b32.xlu1 %v892_v20, %s828_s30  ;;  %271 = vrot.lane.b32.xlu2 %v889_v19, %s828_s30 }
  0x48   : > { %267 = vrot.lane.b32.xlu0 %v895_v21, %s828_s30 }
  0x4f   : > { %257 = vrot.lane.b32.xlu1 %v892_v20, %s829_s5  ;;  %259 = vrot.lane.b32.xlu2 %v889_v19, %s829_s5 }
  0x50   : > { %255 = vrot.lane.b32.xlu0 %v895_v21, %s829_s5 }
  0x57   : > { %243 = vrot.lane.b32.xlu1 %v895_v21, %s830_s6  ;;  %245 = vrot.lane.b32.xlu2 %v892_v20, %s830_s6 }
  0x58   : > { %265 = vrot.lane.b32.xlu0 %v914_v31, %s828_s30 }
  0x5f   : > { %253 = vrot.lane.b32.xlu1 %v914_v31, %s829_s5  ;;  %241 = vrot.lane.b32.xlu2 %v914_v31, %s830_s6 }
  0x60   : > { %247 = vrot.lane.b32.xlu0 %v889_v19, %s830_s6 }
  0x68   : > { %333 = vrot.lane.b32.xlu0 %v290_v28, %s823_s25 }
  0x71   : > { %v318_v32 = vpop.permute.xlu2 %317 }
  0x79   : > { %v320_v33 = vpop.permute.xlu2 %319 }
  0x7a   : > { %v325_v53 = vsel %vm323_vm1, %v318_v32, %v320_v33 }
  0x81   : > { %v933_v34 = vpop.permute.xlu2 %307 }
  0x89   : > { %v935_v35 = vpop.permute.xlu1 %331  ;;  %v294_v37 = vpop.permute.xlu2 %293 }
  0x8a   : > { %v328_v36 = vpop.permute.xlu0 %327 }
  0x8b   : > { %441 = vrot.lane.b32.xlu2 %v328_v36, %s831_s7 }
  0x91   : > { %v316_v38 = vpop.permute.xlu1 %315  ;;  %v278_v40 = vpop.permute.xlu2 %277 }
  0x92   : > { %v330_v39 = vpop.permute.xlu0 %329  ;;  %v324_v46 = vsel %vm323_vm1, %v316_v38, %v318_v32 }
  0x93   : > { %433 = vrot.lane.b32.xlu2 %v316_v38, %s831_s7  ;;  %v337_v45 = vsel %vm335_vm0, %v330_v39, %v935_v35  ;;  %v336_v47 = vsel %vm335_vm0, %v328_v36, %v330_v39 }
  0x99   : > { %v306_v41 = vpop.permute.xlu1 %305  ;;  %v298_v49 = vpop.permute.xlu2 %297 }
  0x9a   : > { %v304_v42 = vpop.permute.xlu0 %303  ;;  %v313_v60 = vsel %vm311_vm2, %v306_v41, %v933_v34 }
  0x9b   : > { %409 = vrot.lane.b32.xlu2 %v278_v40, %s831_s7  ;;  %425 = vrot.lane.b32.xlu0 %v304_v42, %s831_s7  ;;  %v312_v51 = vsel %vm311_vm2, %v304_v42, %v306_v41  ;;  %v766_v41 = vld [vmem:[%s1153_s1 + $0x8] sm:$0xf0] }
  0xa1   : > { %v292_v43 = vpop.permute.xlu1 %291  ;;  %v272_v58 = vpop.permute.xlu2 %271 }
  0xa2   : > { %v322_v44 = vpop.permute.xlu0 %321  ;;  %417 = vrot.lane.b32.xlu1 %v292_v43, %s831_s7  ;;  %v300_v2 = vsel %vm299_vm3, %v292_v43, %v294_v37 }
  0xa3   : > { %445 = vrot.lane.b32.xlu2 %v337_v45, %s831_s7  ;;  %435 = vrot.lane.b32.xlu0 %v324_v46, %s831_s7  ;;  %v326_v56 = vsel %vm323_vm1, %v320_v33, %v322_v44 }
  0xa9   : > { %v310_v48 = vpop.permute.xlu1 %309  ;;  %v260_v0 = vpop.permute.xlu2 %259 }
  0xaa   : > { %v296_v50 = vpop.permute.xlu0 %295  ;;  %443 = vrot.lane.b32.xlu1 %v336_v47, %s831_s7  ;;  %v314_v7 = vsel %vm311_vm2, %v933_v34, %v310_v48 }
  0xab   : > { %427 = vrot.lane.b32.xlu0 %v312_v51, %s831_s7  ;;  %v301_v52 = vsel %vm299_vm3, %v294_v37, %v296_v50  ;;  %v302_v61 = vsel %vm299_vm3, %v296_v50, %v298_v49 }
  0xac   : > { %421 = vrot.lane.b32.xlu2 %v301_v52, %s831_s7  ;;  %v788_v52 = vld [vmem:[%s1153_s1 + $0x14] sm:$0xf] }
  0xb1   : > { %v282_v54 = vpop.permute.xlu1 %281  ;;  %v246_v6 = vpop.permute.xlu2 %245 }
  0xb2   : > { %v280_v55 = vpop.permute.xlu0 %279  ;;  %437 = vrot.lane.b32.xlu1 %v325_v53, %s831_s7  ;;  %v774_v53 = vld [vmem:[%s1153_s1 + $0x18] sm:$0xf0] }
  0xb3   : > { %439 = vrot.lane.b32.xlu0 %v326_v56, %s831_s7  ;;  %v284_v57 = vsel %vm283_vm4, %v278_v40, %v280_v55  ;;  %v285_v59 = vsel %vm283_vm4, %v280_v55, %v282_v54  ;;  %v786_v40 = vld [vmem:[%s1153_s1 + $0x4] sm:$0xf] }
  0xb4   : > { %411 = vrot.lane.b32.xlu2 %v284_v57, %s831_s7  ;;  %v1017_v42 = vor.u32 %v786_v40, %v766_v41 }
  0xb9   : > { %v270_v62 = vpop.permute.xlu1 %269  ;;  %v242_v15 = vpop.permute.xlu2 %241 }
  0xba   : > { %v268_v63 = vpop.permute.xlu0 %267  ;;  %429 = vrot.lane.b32.xlu1 %v313_v60, %s831_s7  ;;  %v276_v11 = vsel %vm273_vm5, %v270_v62, %v272_v58 }
  0xbb   : > { %413 = vrot.lane.b32.xlu0 %v285_v59, %s831_s7  ;;  %v275_v1 = vsel %vm273_vm5, %v268_v63, %v270_v62 }
  0xbc   : > { %423 = vrot.lane.b32.xlu2 %v302_v61, %s831_s7 }
  0xc1   : > { %v258_v3 = vpop.permute.xlu1 %257 }
  0xc2   : > { %419 = vrot.lane.b32.xlu1 %v300_v2, %s831_s7  ;;  %v264_v4 = vsel %vm261_vm6, %v258_v3, %v260_v0  ;;  %v256_v5 = vpop.permute.xlu0 %255 }
  0xc3   : > { %403 = vrot.lane.b32.xlu0 %v275_v1, %s831_s7  ;;  %v263_v16 = vsel %vm261_vm6, %v256_v5, %v258_v3 }
  0xc4   : > { %397 = vrot.lane.b32.xlu2 %v264_v4, %s831_s7 }
  0xc9   : > { %v244_v8 = vpop.permute.xlu1 %243 }
  0xca   : > { %431 = vrot.lane.b32.xlu1 %v314_v7, %s831_s7  ;;  %v251_v9 = vsel %vm249_vm7, %v244_v8, %v246_v6  ;;  %v266_v10 = vpop.permute.xlu0 %265  ;;  %v250_v17 = vsel %vm249_vm7, %v242_v15, %v244_v8  ;;  %v215_v7 = vld [vmem:[%s1154_s2] sm:$0xff]  ;;  %v832_v8 = vmov 0   ;;  %v217_v15 = vld [vmem:[%s1154_s2 + $0x10] sm:$0xff] }
  0xcb   : > { %415 = vrot.lane.b32.xlu0 %v282_v54, %s831_s7  ;;  %v274_v12 = vsel %vm273_vm5, %v266_v10, %v268_v63  ;;  %v1032_v54 = vor.u32 %v788_v52, %v774_v53  ;;  %811 = vset.pattern.permute.xlu1 %v832_v8 }
  0xcc   : > { %387 = vrot.lane.b32.xlu2 %v251_v9, %s831_s7  ;;  %813 = vset.pattern.permute.xlu0 %v832_v8 }
  0xcd   : > { %812 = vset.pattern.permute.xlu2 %v832_v8 }
  0xd1   : > { %v254_v18 = vpop.permute.xlu1 %253 }
  0xd2   : > { %405 = vrot.lane.b32.xlu1 %v276_v11, %s831_s7  ;;  %v248_v13 = vpop.permute.xlu0 %247  ;;  %v262_v22 = vsel %vm261_vm6, %v254_v18, %v256_v5 }
  0xd3   : > { %401 = vrot.lane.b32.xlu0 %v274_v12, %s831_s7  ;;  %v252_v14 = vsel %vm249_vm7, %v246_v6, %v248_v13 }
  0xd4   : > { %399 = vrot.lane.b32.xlu2 %v260_v0, %s831_s7 }
  0xda   : > { %395 = vrot.lane.b32.xlu1 %v263_v16, %s831_s7  ;;  %v334_v23 = vpop.permute.xlu0 %333  ;;  %v218_v16 = vld [vmem:[%s1154_s2 + $0x18] sm:$0xff] }
  0xdb   : > { %389 = vrot.lane.b32.xlu0 %v252_v14, %s831_s7 }
  0xdc   : > { %385 = vrot.lane.b32.xlu2 %v250_v17, %s831_s7  ;;  %v216_v17 = vld [vmem:[%s1154_s2 + $0x8] sm:$0xff] }
  0xe2   : > { %407 = vrot.lane.b32.xlu1 %v272_v58, %s831_s7 }
  0xe3   : > { %379 = vrot.lane.b32.xlu0 %v895_v21, %s831_s7  ;;  %v338_v21 = vsel %vm335_vm0, %v935_v35, %v334_v23 }
  0xe4   : > { %377 = vrot.lane.b32.xlu2 %v914_v31, %s831_s7 }
  0xe5   : > { %v442_v24 = vpop.permute.xlu2 %441 }
  0xea   : > { %393 = vrot.lane.b32.xlu1 %v262_v22, %s831_s7 }
  0xeb   : > { %391 = vrot.lane.b32.xlu0 %v248_v13, %s831_s7 }
  0xec   : > { %346 = vperm.xlu2 %812, %v216_v17  }
  0xed   : > { %v434_v25 = vpop.permute.xlu2 %433 }
  0xf2   : > { %381 = vrot.lane.b32.xlu1 %v892_v20, %s831_s7 }
  0xf3   : > { %383 = vrot.lane.b32.xlu0 %v889_v19, %s831_s7 }
  0xf5   : > { %v410_v26 = vpop.permute.xlu2 %409 }
  0xfa   : > { %447 = vrot.lane.b32.xlu1 %v338_v21, %s831_s7 }
  0xfb   : > { %351 = vperm.xlu0 %813, %v217_v15  }
  0xfd   : > { %v1002_v30 = vpop.permute.xlu2 %445 }
 0x102   : > { %341 = vperm.xlu1 %811, %v215_v7  }
 0x106   : > { %v422_v35 = vpop.permute.xlu2 %421 }
 0x10a   : > { %356 = vperm.xlu1 %811, %v218_v16  }
 0x10d   : > { %v426_v27 = vpop.permute.xlu0 %425 }
 0x10e   : > { %v412_v43 = vpop.permute.xlu2 %411 }
 0x10f   : > { %v462_v55 = vsel %vm449_vm8, %v410_v26, %v412_v43 }
 0x114   : > { %v418_v28 = vpop.permute.xlu1 %417 }
 0x115   : > { %v436_v29 = vpop.permute.xlu0 %435 }
 0x116   : > { %v471_v20 = vsel %vm449_vm8, %v434_v25, %v436_v29  ;;  %v424_v47 = vpop.permute.xlu2 %423 }
 0x117   : > { %511 = vmatpush.bf16.msra.mxu0 %v471_v20  ;;  %v467_v61 = vsel %vm449_vm8, %v422_v35, %v424_v47 }
 0x11c   : > { %v444_v31 = vpop.permute.xlu1 %443 }
 0x11d   : > { %v428_v19 = vpop.permute.xlu0 %427  ;;  %v474_v32 = vsel %vm449_vm8, %v442_v24, %v444_v31  ;;  %v475_v33 = vsel %vm449_vm8, %v444_v31, %v1002_v30 }
 0x11e   : > { %v468_v34 = vsel %vm449_vm8, %v426_v27, %v428_v19  ;;  %537 = vmatpush.bf16.msra.mxu1 %v474_v32  ;;  %575 = vmatpush.bf16.msra.mxu3 %v475_v33  ;;  %v398_v57 = vpop.permute.xlu2 %397  ;;  %v764_v27 = vld [vmem:[%s1153_s1] sm:$0xf] }
 0x11f   : > { %512 = vmatpush.bf16.msra.mxu0 %v468_v34 }
 0x121   : > { %780 = vmatmul.msk.bf16.vlgmr.msra.gmra.mxu3 %vm504_vm9, %v1017_v42  ;;  %778 = vmatmul.msk.bf16.vlgmr.msra.gmra.mxu1 %vm504_vm9, %v1017_v42 }
 0x124   : > { %v438_v36 = vpop.permute.xlu1 %437 }
 0x125   : > { %v440_v37 = vpop.permute.xlu0 %439  ;;  %v472_v38 = vsel %vm449_vm8, %v436_v29, %v438_v36 }
 0x126   : > { %549 = vmatpush.bf16.msra.mxu2 %v472_v38  ;;  %v473_v39 = vsel %vm449_vm8, %v438_v36, %v440_v37  ;;  %v388_v2 = vpop.permute.xlu2 %387  ;;  %v772_v36 = vld [vmem:[%s1153_s1 + $0x10] sm:$0xf]  ;;  %v789_v37 = vld [vmem:[%s1153_s1 + $0x14] sm:$0xf0] }
 0x127   : > { %587 = vmatpush.bf16.msrb.mxu1 %v473_v39  ;;  %v773_v38 = vor.u32 %v789_v37, %v772_v36 }
 0x12c   : > { %v430_v44 = vpop.permute.xlu1 %429 }
 0x12d   : > { %v414_v45 = vpop.permute.xlu0 %413  ;;  %v469_v46 = vsel %vm449_vm8, %v428_v19, %v430_v44 }
 0x12e   : > { %550 = vmatpush.bf16.msra.mxu2 %v469_v46  ;;  %v463_v56 = vsel %vm449_vm8, %v412_v43, %v414_v45  ;;  %v400_v9 = vpop.permute.xlu2 %399  ;;  %v199_v43 = vld [vmem:[%s1155_s3] sm:$0x7] }
 0x12f   : > { %v458_v14 = vsel %vm449_vm8, %v398_v57, %v400_v9  ;;  %vm200_vm10 = vcmp.gt.f32.partialorder %v199_v43, 0.5 }
 0x130   : > { %v661_v46 = vsel %vm200_vm10, 1, %v832_v8 }
 0x131   : > { %781 = vmatmul.msk.bf16.gmra.mxu3 %vm504_vm9, %v1032_v54  ;;  %779 = vmatmul.msk.bf16.gmra.mxu1 %vm504_vm9, %v1032_v54 }
 0x134   : > { %v420_v48 = vpop.permute.xlu1 %419 }
 0x135   : > { %v404_v49 = vpop.permute.xlu0 %403  ;;  %v465_v50 = vsel %vm449_vm8, %v418_v28, %v420_v48  ;;  %v466_v51 = vsel %vm449_vm8, %v420_v48, %v422_v35  ;;  %v787_v28 = vld [vmem:[%s1153_s1 + $0x4] sm:$0xf0] }
 0x136   : > { %513 = vmatpush.bf16.msra.mxu0 %v465_v50  ;;  %551 = vmatpush.bf16.msra.mxu2 %v466_v51  ;;  %v386_v18 = vpop.permute.xlu2 %385  ;;  %v765_v32 = vor.u32 %v787_v28, %v764_v27 }
 0x137   : > { %v453_v25 = vsel %vm449_vm8, %v386_v18, %v388_v2 }
 0x13a   : > { %514 = vmatpush.bf16.msra.mxu0 %v462_v55  ;;  %552 = vmatpush.bf16.msra.mxu2 %v463_v56  ;;  %v663_v56 = vperm.slane %v661_v46, 1 }
 0x13c   : > { %v432_v58 = vpop.permute.xlu1 %431  ;;  %vm1105_vm13 = vcmp.eq.s32.totalorder %v663_v56, 1 }
 0x13d   : > { %v416_v59 = vpop.permute.xlu0 %415  ;;  %v470_v60 = vsel %vm449_vm8, %v430_v44, %v432_v58 }
 0x13e   : > { %588 = vmatpush.bf16.msrb.mxu1 %v470_v60  ;;  %v464_v1 = vsel %vm449_vm8, %v414_v45, %v416_v59  ;;  %v378_v26 = vpop.permute.xlu2 %377 }
 0x142   : > { %589 = vmatpush.bf16.msrb.mxu1 %v467_v61 }
 0x144   : > { %v406_v62 = vpop.permute.xlu1 %405 }
 0x145   : > { %v402_v63 = vpop.permute.xlu0 %401  ;;  %v460_v0 = vsel %vm449_vm8, %v404_v49, %v406_v62 }
 0x146   : > { %v459_v3 = vsel %vm449_vm8, %v402_v63, %v404_v49  ;;  %553 = vmatpush.bf16.msra.mxu2 %v460_v0  ;;  %590 = vmatpush.bf16.msrb.mxu1 %v464_v1  ;;  %v662_v49 = vperm.slane %v661_v46, 0  ;;  %v347_v58 = vpop.permute.xlu2 %346 }
 0x147   : > { %515 = vmatpush.bf16.msra.mxu0 %v459_v3 }
 0x148   : > { %vm1096_vm11 = vcmp.eq.s32.totalorder %v662_v49, 1 }
 0x14c   : > { %v396_v4 = vpop.permute.xlu1 %395 }
 0x14d   : > { %v390_v5 = vpop.permute.xlu0 %389  ;;  %v457_v6 = vsel %vm449_vm8, %v396_v4, %v398_v57 }
 0x14e   : > { %554 = vmatpush.bf16.msra.mxu2 %v457_v6  ;;  %v454_v10 = vsel %vm449_vm8, %v388_v2, %v390_v5 }
 0x152   : > { %555 = vmatpush.bf16.msra.mxu2 %v454_v10 }
 0x154   : > { %v408_v11 = vpop.permute.xlu1 %407 }
 0x155   : > { %v380_v12 = vpop.permute.xlu0 %379  ;;  %v461_v13 = vsel %vm449_vm8, %v406_v62, %v408_v11 }
 0x156   : > { %591 = vmatpush.bf16.msrb.mxu1 %v461_v13  ;;  %v450_v31 = vsel %vm449_vm8, %v378_v26, %v380_v12 }
 0x15a   : > { %592 = vmatpush.bf16.msrb.mxu1 %v458_v14 }
 0x15c   : > { %v394_v22 = vpop.permute.xlu1 %393 }
 0x15d   : > { %v392_v23 = vpop.permute.xlu0 %391  ;;  %v456_v24 = vsel %vm449_vm8, %v394_v22, %v396_v4 }
 0x15e   : > { %516 = vmatpush.bf16.msra.mxu0 %v456_v24  ;;  %v455_v21 = vsel %vm449_vm8, %v390_v5, %v392_v23  ;;  %v664_v5 = vperm.slane %v661_v46, 2 }
 0x15f   : > { %593 = vmatpush.bf16.msrb.mxu1 %v455_v21 }
 0x160   : > { %vm1114_vm0 = vcmp.eq.s32.totalorder %v664_v5, 1 }
 0x162   : > { %517 = vmatpush.bf16.msra.mxu0 %v453_v25 }
 0x164   : > { %v382_v29 = vpop.permute.xlu1 %381 }
 0x165   : > { %v384_v20 = vpop.permute.xlu0 %383  ;;  %v451_v19 = vsel %vm449_vm8, %v380_v12, %v382_v29 }
 0x166   : > { %518 = vmatpush.bf16.msra.mxu0 %v450_v31  ;;  %556 = vmatpush.bf16.msra.mxu2 %v451_v19  ;;  %v452_v33 = vsel %vm449_vm8, %v382_v29, %v384_v20 }
 0x167   : > { %594 = vmatpush.bf16.msrb.mxu1 %v452_v33 }
 0x169   : > { %519 = vmatmul.bf16.vlgmr.msra.gmra.mxu0 %v765_v32  ;;  %557 = vmatmul.bf16.vlgmr.msra.gmra.mxu2 %v765_v32 }
 0x16a   : > { %595 = vmatmul.bf16.vlgmr.msrb.gmra.mxu1 %v765_v32 }
 0x16c   : > { %v448_v34 = vpop.permute.xlu1 %447 }
 0x16d   : > { %v476_v35 = vsel %vm449_vm8, %v1002_v30, %v448_v34  ;;  %v352_v8 = vpop.permute.xlu0 %351 }
 0x16e   : > { %613 = vmatpush.bf16.msrb.mxu3 %v476_v35 }
 0x171   : > { %782 = vmatmul.msk.bf16.vlgmr.msrb.gmra.mxu3 %vm504_vm9, %v1017_v42 }
 0x174   : > { %v342_v47 = vpop.permute.xlu1 %341 }
 0x179   : > { %524 = vmatmul.bf16.gmra.mxu0 %v773_v38  ;;  %562 = vmatmul.bf16.gmra.mxu2 %v773_v38 }
 0x17a   : > { %600 = vmatmul.bf16.gmra.mxu1 %v773_v38 }
 0x17c   : > { %v357_v20 = vpop.permute.xlu1 %356 }
 0x181   : > { %783 = vmatmul.msk.bf16.gmra.mxu3 %vm504_vm9, %v1032_v54 }
 0x19e   : > { %v539_v30 = vpop.f32.mrf.mxu1 }
 0x1a4   : > { %v577_v40 = vpop.f32.mrf.mxu3 }
 0x1a6   : > { %v541_v39 = vpop.f32.mrf.mxu1 }
 0x1ac   : > { %v579_v42 = vpop.f32.mrf.mxu3 }
 0x1ae   : > { %v544_v41 = vpop.f32.mrf.mxu1 }
 0x1b4   : > { %v1093_v45 = vpop.f32.mrf.mxu3 }
 0x1b6   : > { %v1091_v44 = vpop.f32.mrf.mxu1 }
 0x1bc   : > { %v1100_v55 = vpop.f32.mrf.mxu3 }
 0x1e6   : > { %v520_v48 = vpop.f32.mrf.mxu0 }
 0x1e7   : > { %v521_v50 = vadd.f32 %v520_v48, %v342_v47  ;;  %v596_v52 = vpop.f32.mrf.mxu1 }
 0x1e8   : > { %v597_v4 = vadd.f32 %v596_v52, %v342_v47 }
 0x1e9   : > { %v540_v51 = vadd.f32 %v539_v30, %v521_v50 }
 0x1eb   : > { %vm625_vm12 = vcmp.ge.f32.partialorder %v540_v51, 0.0  ;;  %v637_v54 = vmul.f32 0.01, %v540_v51 }
 0x1ec   : > { %v558_v57 = vpop.f32.mrf.mxu2 }
 0x1ed   : > { %v649_v59 = vsel %vm625_vm12, %v540_v51, %v637_v54  ;;  %v559_v60 = vadd.f32 %v558_v57, %v342_v47 }
 0x1ee   : > { %v668_v61 = vsel %vm1096_vm11, %v649_v59, 0.0  ;;  %v522_v62 = vpop.f32.mrf.mxu0 }
 0x1ef   : > { %688 = vst [vmem:[%s874_s24 + $0x8] sm:$0xff] %v668_v61  ;;  %v578_v63 = vadd.f32 %v577_v40, %v559_v60  ;;  %v523_v0 = vadd.f32 %v522_v62, %v347_v58  ;;  %v598_v9 = vpop.f32.mrf.mxu1 }
 0x1f0   : > { %v599_v31 = vadd.f32 %v598_v9, %v347_v58 }
 0x1f1   : > { %vm626_vm14 = vcmp.ge.f32.partialorder %v578_v63, 0.0  ;;  %v638_v2 = vmul.f32 0.01, %v578_v63  ;;  %v542_v3 = vadd.f32 %v541_v39, %v523_v0 }
 0x1f3   : > { %v650_v6 = vsel %vm626_vm14, %v578_v63, %v638_v2  ;;  %vm628_vm15 = vcmp.ge.f32.partialorder %v542_v3, 0.0  ;;  %v640_v7 = vmul.f32 0.01, %v542_v3 }
 0x1f4   : > { %v669_v10 = vsel %vm1105_vm13, %v650_v6, 0.0  ;;  %v560_v11 = vpop.f32.mrf.mxu2  ;;  %v615_v12 = vpop.f32.mrf.mxu3 }
 0x1f5   : > { %689 = vst [vmem:[%s874_s24 + $0x10] sm:$0xff] %v669_v10  ;;  %v652_v13 = vsel %vm628_vm15, %v542_v3, %v640_v7  ;;  %v561_v14 = vadd.f32 %v560_v11, %v347_v58  ;;  %v616_v15 = vadd.f32 %v615_v12, %v597_v4 }
 0x1f6   : > { %v671_v16 = vsel %vm1096_vm11, %v652_v13, 0.0  ;;  %v525_v17 = vpop.f32.mrf.mxu0 }
 0x1f7   : > { %691 = vst [vmem:[%s874_s24 + $0x30] sm:$0xff] %v671_v16  ;;  %v580_v22 = vadd.f32 %v579_v42, %v561_v14  ;;  %v526_v23 = vadd.f32 %v525_v17, %v352_v8  ;;  %vm627_vm1 = vcmp.ge.f32.partialorder %v616_v15, 0.0  ;;  %v639_v24 = vmul.f32 0.01, %v616_v15  ;;  %v601_v30 = vpop.f32.mrf.mxu1 }
 0x1f8   : > { %v602_v42 = vadd.f32 %v601_v30, %v352_v8 }
 0x1f9   : > { %vm629_vm2 = vcmp.ge.f32.partialorder %v580_v22, 0.0  ;;  %v641_v21 = vmul.f32 0.01, %v580_v22  ;;  %v545_v25 = vadd.f32 %v544_v41, %v526_v23  ;;  %v651_v26 = vsel %vm627_vm1, %v616_v15, %v639_v24 }
 0x1fa   : > { %v670_v27 = vsel %vm1114_vm0, %v651_v26, 0.0 }
 0x1fb   : > { %v653_v28 = vsel %vm629_vm2, %v580_v22, %v641_v21  ;;  %vm631_vm3 = vcmp.ge.f32.partialorder %v545_v25, 0.0  ;;  %v643_v29 = vmul.f32 0.01, %v545_v25  ;;  %690 = vst [vmem:[%s874_s24 + $0x18] sm:$0xff] %v670_v27 }
 0x1fc   : > { %v672_v19 = vsel %vm1105_vm13, %v653_v28, 0.0  ;;  %v563_v32 = vpop.f32.mrf.mxu2  ;;  %v617_v33 = vpop.f32.mrf.mxu3 }
 0x1fd   : > { %692 = vst [vmem:[%s874_s24 + $0x38] sm:$0xff] %v672_v19  ;;  %v655_v34 = vsel %vm631_vm3, %v545_v25, %v643_v29  ;;  %v564_v35 = vadd.f32 %v563_v32, %v352_v8  ;;  %v618_v36 = vadd.f32 %v617_v33, %v599_v31 }
 0x1fe   : > { %v674_v37 = vsel %vm1096_vm11, %v655_v34, 0.0  ;;  %v527_v38 = vpop.f32.mrf.mxu0 }
 0x1ff   : > { %694 = vst [vmem:[%s874_s24 + $0x58] sm:$0xff] %v674_v37  ;;  %v583_v39 = vadd.f32 %v1093_v45, %v564_v35  ;;  %v528_v40 = vadd.f32 %v527_v38, %v357_v20  ;;  %vm630_vm4 = vcmp.ge.f32.partialorder %v618_v36, 0.0  ;;  %v642_v41 = vmul.f32 0.01, %v618_v36  ;;  %v603_v60 = vpop.f32.mrf.mxu1 }
 0x200   : > { %v604_v2 = vadd.f32 %v603_v60, %v357_v20 }
 0x201   : > { %vm632_vm5 = vcmp.ge.f32.partialorder %v583_v39, 0.0  ;;  %v644_v43 = vmul.f32 0.01, %v583_v39  ;;  %v547_v46 = vadd.f32 %v1091_v44, %v528_v40  ;;  %v654_v47 = vsel %vm630_vm4, %v618_v36, %v642_v41 }
 0x202   : > { %v673_v48 = vsel %vm1114_vm0, %v654_v47, 0.0 }
 0x203   : > { %v656_v49 = vsel %vm632_vm5, %v583_v39, %v644_v43  ;;  %vm634_vm6 = vcmp.ge.f32.partialorder %v547_v46, 0.0  ;;  %v646_v50 = vmul.f32 0.01, %v547_v46  ;;  %693 = vst [vmem:[%s874_s24 + $0x40] sm:$0xff] %v673_v48 }
 0x204   : > { %v675_v45 = vsel %vm1105_vm13, %v656_v49, 0.0  ;;  %v565_v51 = vpop.f32.mrf.mxu2  ;;  %v620_v52 = vpop.f32.mrf.mxu3 }
 0x205   : > { %695 = vst [vmem:[%s874_s24 + $0x60] sm:$0xff] %v675_v45  ;;  %v658_v54 = vsel %vm634_vm6, %v547_v46, %v646_v50  ;;  %v566_v56 = vadd.f32 %v565_v51, %v357_v20  ;;  %v621_v57 = vadd.f32 %v620_v52, %v602_v42 }
 0x206   : > { %v677_v44 = vsel %vm1096_vm11, %v658_v54, 0.0 }
 0x207   : > { %697 = vst [vmem:[%s874_s24 + $0x80] sm:$0xff] %v677_v44  ;;  %v585_v58 = vadd.f32 %v1100_v55, %v566_v56  ;;  %vm633_vm7 = vcmp.ge.f32.partialorder %v621_v57, 0.0  ;;  %v645_v59 = vmul.f32 0.01, %v621_v57 }
 0x209   : > { %vm635_vm8 = vcmp.ge.f32.partialorder %v585_v58, 0.0  ;;  %v647_v61 = vmul.f32 0.01, %v585_v58  ;;  %v657_v62 = vsel %vm633_vm7, %v621_v57, %v645_v59 }
 0x20a   : > { %v676_v63 = vsel %vm1114_vm0, %v657_v62, 0.0 }
 0x20b   : > { %v659_v0 = vsel %vm635_vm8, %v585_v58, %v647_v61  ;;  %696 = vst [vmem:[%s874_s24 + $0x68] sm:$0xff] %v676_v63 }
 0x20c   : > { %v678_v53 = vsel %vm1105_vm13, %v659_v0, 0.0  ;;  %v622_v3 = vpop.f32.mrf.mxu3 }
 0x20d   : > { %698 = vst [vmem:[%s874_s24 + $0x88] sm:$0xff] %v678_v53  ;;  %v623_v4 = vadd.f32 %v622_v3, %v604_v2 }
 0x20f   : > { %vm636_vm9 = vcmp.ge.f32.partialorder %v623_v4, 0.0  ;;  %v648_v55 = vmul.f32 0.01, %v623_v4 }
 0x211   : > { %v660_v5 = vsel %vm636_vm9, %v623_v4, %v648_v55 }
 0x212   : > { %v679_v6 = vsel %vm1114_vm0, %v660_v5, 0.0 }
 0x213   : > { %699 = vst [vmem:[%s874_s24 + $0x90] sm:$0xff] %v679_v6 }
 0x214 PF: > { %s14_s15 = sadd.s32 1, %s820_s15  }
 0x215   : > { %p11_p4 = scmp.ge.s32.totalorder %s14_s15, 4  }
 0x217   :  { %13 = sbr.rel (!%p11_p4) target bundleno = 1 (0x1), region = 66 }

</bundles_post_ra>
